<compile_context>
chip_gen: v6e
topology: v6e:2x2x1
jax: 0.10.0
libtpu: 0.0.40
codegen_flags: <defaults>
</compile_context>

<pallas_src>
import functools

import jax
import jax.numpy as jnp
from jax.experimental import pallas as pl
from jax.experimental.pallas import tpu as pltpu


def _round_up(x: int, m: int) -> int:
    return ((x + m - 1) // m) * m


def _round_down(x: int, m: int) -> int:
    return (x // m) * m


def _sublane(dtype) -> int:
    # Packed vreg tile height: 8 rows for 4-byte types, 16 for bf16, 32 for int8.
    return max(8, 32 // jnp.dtype(dtype).itemsize)


def _vmem_capacity_bytes() -> int:
    # Generation-aware cap: ~128 MiB on v5e/v6e, 64 MiB per TensorCore on v7x.
    try:
        cap = int(getattr(pltpu.get_tpu_info(), "vmem_capacity_bytes", 0))
        if cap > 0:
            return cap
    except Exception:
        pass
    return 64 << 20  # conservative fallback (v7x per-core VMEM)


# ---------------------------------------------------------------------------
# Kernels
# ---------------------------------------------------------------------------

def _mlp_fused_kernel(x_ref, w1_ref, w2_ref, o_ref):
    """Both weights VMEM-resident: two MXU matmuls + VPU ReLU per row tile."""
    h = jnp.dot(x_ref[...], w1_ref[...], preferred_element_type=jnp.float32)
    h = jnp.maximum(h, 0.0)
    y = jnp.dot(h.astype(w2_ref.dtype), w2_ref[...],
                preferred_element_type=jnp.float32)
    o_ref[...] = y.astype(o_ref.dtype)


def _mlp_ktiled_kernel(x_ref, w1_ref, w2_ref, o_ref, acc_ref):
    """Fallback when W1 does not fit in VMEM: reduce GEMM1 over K tiles of F."""
    k = pl.program_id(1)

    @pl.when(k == 0)
    def _():
        acc_ref[...] = jnp.zeros_like(acc_ref)

    acc_ref[...] += jnp.dot(x_ref[...], w1_ref[...],
                            preferred_element_type=jnp.float32)

    @pl.when(k == pl.num_programs(1) - 1)
    def _():
        h = jnp.maximum(acc_ref[...], 0.0)
        y = jnp.dot(h.astype(w2_ref.dtype), w2_ref[...],
                    preferred_element_type=jnp.float32)
        o_ref[...] = y.astype(o_ref.dtype)


# ---------------------------------------------------------------------------
# Wrapper
# ---------------------------------------------------------------------------

@functools.partial(
    jax.jit,
    static_argnames=("tile_n", "tile_k", "use_bf16", "force_k_tiling"))
def mlp_forward(x, w1, w2, *, tile_n: int = 512, tile_k: int = 512,
                use_bf16: bool = False, force_k_tiling: bool = False):
    """Eval-mode MLP forward: relu(x @ w1) @ w2.

    x: (N, F); w1: (F, H); w2: (H, O); returns (N, O) in x's original dtype.
    """
    N, F = x.shape
    assert w1.shape[0] == F and w2.shape[0] == w1.shape[1], (x.shape, w1.shape, w2.shape)
    H = w1.shape[1]
    O = w2.shape[1]
    out_dtype = x.dtype

    if use_bf16:
        # bf16 operands keep the v6e/v7x MXU fed; accumulation stays f32.
        x = x.astype(jnp.bfloat16)
        w1 = w1.astype(jnp.bfloat16)
        w2 = w2.astype(jnp.bfloat16)

    itemsize = jnp.dtype(x.dtype).itemsize
    sub = _sublane(x.dtype)

    cap = _vmem_capacity_bytes()
    budget = int(cap * 0.75)  # leave headroom for compiler-internal scratch

    # Weight footprint. Constant index_maps mean the weights are fetched once,
    # but we still budget the pipeline's default two buffers per operand.
    # (Previous version budgeted 2x weights and then doubled again -> 4x.)
    w_bytes = 2 * (F * H + H * O) * itemsize

    resident = (not force_k_tiling) and (
        w_bytes + 2 * sub * (F + O) * itemsize + sub * (H + O) * 4 <= budget)

    # Advisory cost: unpadded traffic, weights counted once.
    cost = pl.CostEstimate(
        flops=2 * N * F * H + 2 * N * H * O,
        transcendentals=0,
        bytes_accessed=(N * F + F * H + H * O + N * O) * itemsize,
    )

    if resident:
        # Budget-derived row tile: double-buffered x/out tiles + f32 temporaries.
        per_row = 2 * (F + O) * itemsize + (H + O) * 4
        tn_cap = max(sub, _round_down((budget - w_bytes) // per_row, sub))
        TN = max(sub, _round_down(min(tile_n, _round_up(N, sub), tn_cap), sub))
        num_n = pl.cdiv(N, TN)

        needed = (w_bytes + 2 * TN * (F + O) * itemsize + TN * (H + O) * 4
                  + (2 << 20))
        vmem_limit = int(min(cap * 0.9, max(needed, 16 << 20)))

        return pl.pallas_call(
            _mlp_fused_kernel,
            out_shape=jax.ShapeDtypeStruct((N, O), out_dtype),
            grid_spec=pltpu.PrefetchScalarGridSpec(
                num_scalar_prefetch=0,
                grid=(num_n,),
                in_specs=[
                    # x: new row tile per step; full-dim F block (legal even
                    # when F % 128 != 0 because the block dim == array dim).
                    pl.BlockSpec((TN, F), lambda i: (i, 0)),
                    # Weights: constant index_map -> fetched once, VMEM-resident.
                    pl.BlockSpec((F, H), lambda i: (0, 0)),
                    pl.BlockSpec((H, O), lambda i: (0, 0)),
                ],
                # Direct (TN, O) store; no padded output + slice round trip.
                out_specs=pl.BlockSpec((TN, O), lambda i: (i, 0)),
            ),
            compiler_params=pltpu.CompilerParams(
                dimension_semantics=("parallel",),  # rows independent -> megacore
                vmem_limit_bytes=vmem_limit,
            ),
            cost_estimate=cost,
        )(x, w1, w2)

    # ----- K-tiled fallback: W1 streamed through VMEM in (TK, H) tiles -------
    # TK must be a multiple of 128 or equal to the full F dim.
    if F <= 128 or tile_k >= F:
        TK = F
    else:
        TK = max(128, _round_down(min(tile_k, F), 128))
    Fp = _round_up(F, TK)
    if Fp != F:
        # Zero-pad W1 along F so out-of-bounds x columns in the last K tile hit
        # zero weight rows (exact). TODO(synk): hoist this pad to init time.
        w1 = jnp.zeros((Fp, H), w1.dtype).at[:F, :].set(w1)
    num_k = Fp // TK

    w2_bytes = 2 * H * O * itemsize          # W2 resident (constant index)
    w1_tile_bytes = 2 * TK * H * itemsize    # streamed W1 tiles, double-buffered
    per_row = 2 * (TK + O) * itemsize + (H + O) * 4
    tn_cap = max(sub, _round_down(
        max(0, budget - w2_bytes - w1_tile_bytes) // per_row, sub))
    TN = max(sub, _round_down(min(tile_n, _round_up(N, sub), tn_cap), sub))
    num_n = pl.cdiv(N, TN)

    needed = (w2_bytes + w1_tile_bytes + 2 * TN * (TK + O) * itemsize
              + TN * (H + O) * 4 + (2 << 20))
    vmem_limit = int(min(cap * 0.9, max(needed, 16 << 20)))

    # TODO(synk): if H*O alone overflows VMEM (huge output layer), also tile O.
    return pl.pallas_call(
        _mlp_ktiled_kernel,
        out_shape=jax.ShapeDtypeStruct((N, O), out_dtype),
        grid_spec=pltpu.PrefetchScalarGridSpec(
            num_scalar_prefetch=0,
            grid=(num_n, num_k),
            in_specs=[
                pl.BlockSpec((TN, TK), lambda i, k: (i, k)),
                pl.BlockSpec((TK, H), lambda i, k: (k, 0)),
                pl.BlockSpec((H, O), lambda i, k: (0, 0)),
            ],
            out_specs=pl.BlockSpec((TN, O), lambda i, k: (i, 0)),
            scratch_shapes=[pltpu.VMEM((TN, H), jnp.float32)],
        ),
        compiler_params=pltpu.CompilerParams(
            dimension_semantics=("parallel", "arbitrary"),
            vmem_limit_bytes=vmem_limit,
        ),
        cost_estimate=cost,
    )(x, w1, w2)


def reference_mlp(x, w1, w2):
    h = jnp.maximum(x @ w1, 0.0)
    return h @ w2


if __name__ == "__main__":
    key = jax.random.PRNGKey(0)
    k1, k2, k3, k4, k5, k6 = jax.random.split(key, 6)

    # Module config: in_features=32, hids=[16], acts=['relu'], out_features=8,
    # bn=False, dropout=0.5 (identity in eval), bias=False.
    N, F, H, O = 256, 32, 16, 8
    x = jax.random.normal(k1, (N, F), dtype=jnp.float32)
    w1 = jax.random.normal(k2, (F, H), dtype=jnp.float32) * (1.0 / jnp.sqrt(F))
    w2 = jax.random.normal(k3, (H, O), dtype=jnp.float32) * (1.0 / jnp.sqrt(H))

    y_ref = reference_mlp(x, w1, w2)

    # Path 1: resident weights, single grid step (TN = 256), fp32.
    y = mlp_forward(x, w1, w2)
    jax.block_until_ready(y)
    assert y.shape == (N, O), y.shape
    assert jnp.allclose(y, y_ref, atol=1e-5, rtol=1e-5)

    # Path 2: bf16 operand path (f32 accumulation), looser tolerance.
    y_bf16 = mlp_forward(x, w1, w2, use_bf16=True)
    jax.block_until_ready(y_bf16)
    assert y_bf16.shape == (N, O), y_bf16.shape
    assert jnp.allclose(y_bf16, y_ref, atol=5e-2, rtol=5e-2)

    # Path 3: K-tiled fallback (large-F / v7x regime), forced on a small problem.
    N2, F2 = 64, 256
    x2 = jax.random.normal(k4, (N2, F2), dtype=jnp.float32)
    w1b = jax.random.normal(k5, (F2, H), dtype=jnp.float32) * (1.0 / jnp.sqrt(F2))
    w2b = jax.random.normal(k6, (H, O), dtype=jnp.float32) * (1.0 / jnp.sqrt(H))
    y2 = mlp_forward(x2, w1b, w2b, tile_k=128, force_k_tiling=True)
    jax.block_until_ready(y2)
    y2_ref = reference_mlp(x2, w1b, w2b)
    assert y2.shape == (N2, O), y2.shape
    assert jnp.allclose(y2, y2_ref, atol=1e-4, rtol=1e-4)

    print("KERNEL_OK")
</pallas_src>

<mosaic_0001>
module attributes {stable_mosaic.version = 11 : i64} {
  func.func @_mlp_fused_kernel(%arg0: i32, %arg1: memref<256x32xf32, #tpu.memory_space<vmem>>, %arg2: memref<32x16xf32, #tpu.memory_space<vmem>>, %arg3: memref<16x8xf32, #tpu.memory_space<vmem>>, %arg4: memref<256x8xf32, #tpu.memory_space<vmem>>) attributes {dimension_semantics = [#tpu.dimension_semantics<parallel>], iteration_bounds = array<i64: 1>, scalar_prefetch = 0 : i64, scratch_operands = 0 : i64, tpu.core_type = #tpu.core_type<tc>, window_params = [{transform_indices = @transform_0, window_bounds = array<i64: 256, 32>}, {pipeline_mode = #tpu.pipeline_mode<synchronous>, transform_indices = @transform_1, window_bounds = array<i64: 32, 16>}, {pipeline_mode = #tpu.pipeline_mode<synchronous>, transform_indices = @transform_2, window_bounds = array<i64: 16, 8>}, {transform_indices = @transform_3, window_bounds = array<i64: 256, 8>}]} {
    %c0 = arith.constant 0 : index
    %c0_0 = arith.constant 0 : index
    %0 = vector.load %arg1[%c0, %c0_0] : memref<256x32xf32, #tpu.memory_space<vmem>>, vector<256x32xf32>
    %c0_1 = arith.constant 0 : index
    %c0_2 = arith.constant 0 : index
    %1 = vector.load %arg2[%c0_1, %c0_2] : memref<32x16xf32, #tpu.memory_space<vmem>>, vector<32x16xf32>
    %cst = arith.constant dense<0.000000e+00> : vector<256x16xf32>
    %2 = tpu.matmul %0, %1, %cst {dimension_numbers = #tpu.dot_dimension_numbers<[1], [0], [0], [1], [0, 0, 1, 1], [], []>} : vector<256x32xf32>, vector<32x16xf32>, vector<256x16xf32> -> vector<256x16xf32>
    %cst_3 = arith.constant 0.000000e+00 : f32
    %3 = vector.broadcast %cst_3 : f32 to vector<256x16xf32>
    %4 = arith.maximumf %2, %3 : vector<256x16xf32>
    %c0_4 = arith.constant 0 : index
    %c0_5 = arith.constant 0 : index
    %5 = vector.load %arg3[%c0_4, %c0_5] : memref<16x8xf32, #tpu.memory_space<vmem>>, vector<16x8xf32>
    %cst_6 = arith.constant dense<0.000000e+00> : vector<256x8xf32>
    %6 = tpu.matmul %4, %5, %cst_6 {dimension_numbers = #tpu.dot_dimension_numbers<[1], [0], [0], [1], [0, 0, 1, 1], [], []>} : vector<256x16xf32>, vector<16x8xf32>, vector<256x8xf32> -> vector<256x8xf32>
    %c0_7 = arith.constant 0 : index
    %c0_8 = arith.constant 0 : index
    %7 = vector.load %arg4[%c0_7, %c0_8] : memref<256x8xf32, #tpu.memory_space<vmem>>, vector<256x8xf32>
    tpu.vector_store %arg4[%c0_7, %c0_8], %6 {strides = array<i32>} : memref<256x8xf32, #tpu.memory_space<vmem>>, vector<256x8xf32>,
    return
  }
  func.func @transform_0(%arg0: i32) -> (i32, i32) {
    %c0_i32 = arith.constant 0 : i32
    %c0_i32_0 = arith.constant 0 : i32
    return %arg0, %c0_i32 : i32, i32
  }
  func.func @transform_1(%arg0: i32) -> (i32, i32) {
    %c0_i32 = arith.constant 0 : i32
    %c0_i32_0 = arith.constant 0 : i32
    %c0_i32_1 = arith.constant 0 : i32
    return %c0_i32, %c0_i32_0 : i32, i32
  }
  func.func @transform_2(%arg0: i32) -> (i32, i32) {
    %c0_i32 = arith.constant 0 : i32
    %c0_i32_0 = arith.constant 0 : i32
    %c0_i32_1 = arith.constant 0 : i32
    return %c0_i32, %c0_i32_0 : i32, i32
  }
  func.func @transform_3(%arg0: i32) -> (i32, i32) {
    %c0_i32 = arith.constant 0 : i32
    %c0_i32_0 = arith.constant 0 : i32
    return %arg0, %c0_i32 : i32, i32
  }
}

</mosaic_0001>

<bundles_post_ra>
// kernel: mlp_forward.1
= control target key start
LH: loop header
LB: loop body
LE: loop exit
PB: predicated region body
PF: predicated region fallthrough
CT: control target
= control target key end

     0   :  { %vm50_vm0 = vcmask 261120   ;;  %vm406_vm1 = vcmask 130048   ;;  %vm728_vm2 = vcmask 64512   ;;  %s1333_s1 = inlined_call_operand.vmem [shape: f32[32,16], index: 1, kind: input, shape index: {}]   ;;  %s1334_s0 = inlined_call_operand.vmem [shape: f32[256,32], index: 0, kind: input, shape index: {}]   ;;  %s1335_s2 = inlined_call_operand.vmem [shape: f32[16,8], index: 2, kind: input, shape index: {}]   ;;  %s1336_s3 = inlined_call_operand.vmem [shape: f32[256,8], index: 3, kind: output, shape index: {}]  }
   0x1   :  { %v49_v0 = vld [vmem:[%s1333_s1 + $0x18] sm:$0xff]  ;;  %v48_v1 = vld [vmem:[%s1333_s1 + $0x10] sm:$0xff]  ;;  %v14_v2 = vld [vmem:[%s1334_s0] sm:$0xff] }
   0x2   :  { %899 = vmatprep.subr.mxu0 %v49_v0  ;;  %v47_v3 = vld [vmem:[%s1333_s1 + $0x8] sm:$0xff]  ;;  %907 = vmatprep.mubr.msk.f32.mxu0 %vm50_vm0, %v14_v2  ;;  %v46_v4 = vld [vmem:[%s1333_s1] sm:$0xff]  ;;  %v16_v6 = vld [vmem:[%s1334_s0 + $0x10] sm:$0xff] }
   0x3   :  { %900 = vmatpush3.msra.mxu0 %v49_v0  ;;  %v15_v5 = vld [vmem:[%s1334_s0 + $0x8] sm:$0xff]  ;;  %v17_v7 = vld [vmem:[%s1334_s0 + $0x18] sm:$0xff]  ;;  %v18_v8 = vld [vmem:[%s1334_s0 + $0x20] sm:$0xff] }
   0x4   :  { %901 = vmatprep.subr.mxu0 %v48_v1  ;;  %v19_v9 = vld [vmem:[%s1334_s0 + $0x28] sm:$0xff]  ;;  %v20_v10 = vld [vmem:[%s1334_s0 + $0x30] sm:$0xff]  ;;  %v21_v11 = vld [vmem:[%s1334_s0 + $0x38] sm:$0xff] }
   0x5   :  { %902 = vmatpush3.msra.mxu0 %v48_v1  ;;  %v22_v12 = vld [vmem:[%s1334_s0 + $0x40] sm:$0xff]  ;;  %v23_v13 = vld [vmem:[%s1334_s0 + $0x48] sm:$0xff]  ;;  %v24_v14 = vld [vmem:[%s1334_s0 + $0x50] sm:$0xff] }
   0x6   :  { %903 = vmatprep.subr.mxu0 %v47_v3  ;;  %v25_v15 = vld [vmem:[%s1334_s0 + $0x58] sm:$0xff]  ;;  %v26_v16 = vld [vmem:[%s1334_s0 + $0x60] sm:$0xff]  ;;  %v27_v17 = vld [vmem:[%s1334_s0 + $0x68] sm:$0xff] }
   0x7   :  { %904 = vmatpush3.msra.mxu0 %v47_v3  ;;  %v28_v18 = vld [vmem:[%s1334_s0 + $0x70] sm:$0xff]  ;;  %v29_v19 = vld [vmem:[%s1334_s0 + $0x78] sm:$0xff]  ;;  %v30_v20 = vld [vmem:[%s1334_s0 + $0x80] sm:$0xff] }
   0x8   :  { %905 = vmatprep.subr.mxu0 %v46_v4  ;;  %v31_v21 = vld [vmem:[%s1334_s0 + $0x88] sm:$0xff]  ;;  %v32_v22 = vld [vmem:[%s1334_s0 + $0x90] sm:$0xff]  ;;  %v33_v23 = vld [vmem:[%s1334_s0 + $0x98] sm:$0xff] }
   0x9   :  { %906 = vmatpush3.msra.mxu0 %v46_v4  ;;  %v34_v24 = vld [vmem:[%s1334_s0 + $0xa0] sm:$0xff]  ;;  %v35_v25 = vld [vmem:[%s1334_s0 + $0xa8] sm:$0xff]  ;;  %v36_v26 = vld [vmem:[%s1334_s0 + $0xb0] sm:$0xff] }
   0xa   :  { %908 = vmatmul.mubr.msk.f32.vlgmr.msra.gmra.mxu0 %vm50_vm0, %v15_v5  ;;  %v37_v27 = vld [vmem:[%s1334_s0 + $0xb8] sm:$0xff]  ;;  %v38_v28 = vld [vmem:[%s1334_s0 + $0xc0] sm:$0xff]  ;;  %v39_v29 = vld [vmem:[%s1334_s0 + $0xc8] sm:$0xff] }
   0xb   :  { %910 = vmatprep.mubr.msk.f32.mxu0 %vm50_vm0, %v16_v6  ;;  %v40_v30 = vld [vmem:[%s1334_s0 + $0xd0] sm:$0xff]  ;;  %v41_v31 = vld [vmem:[%s1334_s0 + $0xd8] sm:$0xff]  ;;  %v42_v32 = vld [vmem:[%s1334_s0 + $0xe0] sm:$0xff] }
   0xc   :  { %v43_v33 = vld [vmem:[%s1334_s0 + $0xe8] sm:$0xff]  ;;  %v44_v34 = vld [vmem:[%s1334_s0 + $0xf0] sm:$0xff]  ;;  %v45_v35 = vld [vmem:[%s1334_s0 + $0xf8] sm:$0xff] }
   0xd   :  { %v405_v36 = vld [vmem:[%s1335_s2 + $0x8] sm:$0xff]  ;;  %v404_v37 = vld [vmem:[%s1335_s2] sm:$0xff] }
   0xe   :  { %911 = vmatmul.mubr.msk.f32.gmra.mxu0 %vm50_vm0, %v17_v7  ;;  %955 = vmatprep.subr.mxu1 %v405_v36 }
   0xf   :  { %913 = vmatprep.mubr.msk.f32.mxu0 %vm50_vm0, %v18_v8  ;;  %956 = vmatpush3.msra.mxu1 %v405_v36 }
  0x10   :  { %957 = vmatprep.subr.mxu1 %v404_v37 }
  0x11   :  { %958 = vmatpush3.msra.mxu1 %v404_v37 }
  0x12   :  { %914 = vmatmul.mubr.msk.f32.gmra.mxu0 %vm50_vm0, %v19_v9 }
  0x13   :  { %916 = vmatprep.mubr.msk.f32.mxu0 %vm50_vm0, %v20_v10 }
  0x16   :  { %917 = vmatmul.mubr.msk.f32.gmra.mxu0 %vm50_vm0, %v21_v11 }
  0x17   :  { %919 = vmatprep.mubr.msk.f32.mxu0 %vm50_vm0, %v22_v12 }
  0x1a   :  { %920 = vmatmul.mubr.msk.f32.gmra.mxu0 %vm50_vm0, %v23_v13 }
  0x1b   :  { %922 = vmatprep.mubr.msk.f32.mxu0 %vm50_vm0, %v24_v14 }
  0x1e   :  { %923 = vmatmul.mubr.msk.f32.gmra.mxu0 %vm50_vm0, %v25_v15 }
  0x1f   :  { %925 = vmatprep.mubr.msk.f32.mxu0 %vm50_vm0, %v26_v16 }
  0x22   :  { %926 = vmatmul.mubr.msk.f32.gmra.mxu0 %vm50_vm0, %v27_v17 }
  0x23   :  { %928 = vmatprep.mubr.msk.f32.mxu0 %vm50_vm0, %v28_v18 }
  0x26   :  { %929 = vmatmul.mubr.msk.f32.gmra.mxu0 %vm50_vm0, %v29_v19 }
  0x27   :  { %931 = vmatprep.mubr.msk.f32.mxu0 %vm50_vm0, %v30_v20 }
  0x2a   :  { %932 = vmatmul.mubr.msk.f32.gmra.mxu0 %vm50_vm0, %v31_v21 }
  0x2b   :  { %934 = vmatprep.mubr.msk.f32.mxu0 %vm50_vm0, %v32_v22 }
  0x2e   :  { %935 = vmatmul.mubr.msk.f32.gmra.mxu0 %vm50_vm0, %v33_v23 }
  0x2f   :  { %937 = vmatprep.mubr.msk.f32.mxu0 %vm50_vm0, %v34_v24 }
  0x32   :  { %938 = vmatmul.mubr.msk.f32.gmra.mxu0 %vm50_vm0, %v35_v25 }
  0x33   :  { %940 = vmatprep.mubr.msk.f32.mxu0 %vm50_vm0, %v36_v26 }
  0x36   :  { %941 = vmatmul.mubr.msk.f32.gmra.mxu0 %vm50_vm0, %v37_v27 }
  0x37   :  { %943 = vmatprep.mubr.msk.f32.mxu0 %vm50_vm0, %v38_v28 }
  0x3a   :  { %944 = vmatmul.mubr.msk.f32.gmra.mxu0 %vm50_vm0, %v39_v29 }
  0x3b   :  { %946 = vmatprep.mubr.msk.f32.mxu0 %vm50_vm0, %v40_v30 }
  0x3e   :  { %947 = vmatmul.mubr.msk.f32.gmra.mxu0 %vm50_vm0, %v41_v31 }
  0x3f   :  { %949 = vmatprep.mubr.msk.f32.mxu0 %vm50_vm0, %v42_v32 }
  0x42   :  { %950 = vmatmul.mubr.msk.f32.gmra.mxu0 %vm50_vm0, %v43_v33 }
  0x43   :  { %952 = vmatprep.mubr.msk.f32.mxu0 %vm50_vm0, %v44_v34 }
  0x46   :  { %953 = vmatmul.mubr.msk.f32.gmra.mxu0 %vm50_vm0, %v45_v35 }
  0xca   :  { %v909_v38 = vpop.f32.mrf.mxu0 }
  0xcb   :  { %v373_v41 = vmax.f32 %v909_v38, 0.0 }
  0xcc   :  { %v213_v39 = vpop.f32.mrf.mxu0 }
  0xcd   :  { %v372_v40 = vmax.f32 %v213_v39, 0.0 }
  0xce   :  { %v912_v42 = vpop.f32.mrf.mxu0 }
  0xcf   :  { %959 = vmatprep.mubr.msk.f32.mxu1 %vm406_vm1, %v372_v40  ;;  %v375_v45 = vmax.f32 %v912_v42, 0.0 }
  0xd0   :  { %v223_v43 = vpop.f32.mrf.mxu0  ;;  %960 = vmatmul.mubr.msk.f32.vlgmr.msra.gmra.mxu1 %vm406_vm1, %v373_v41 }
  0xd1   :  { %v374_v44 = vmax.f32 %v223_v43, 0.0 }
  0xd2   :  { %v915_v46 = vpop.f32.mrf.mxu0 }
  0xd3   :  { %962 = vmatprep.mubr.msk.f32.mxu1 %vm406_vm1, %v374_v44  ;;  %v377_v49 = vmax.f32 %v915_v46, 0.0 }
  0xd4   :  { %v233_v47 = vpop.f32.mrf.mxu0  ;;  %963 = vmatmul.mubr.msk.f32.gmra.mxu1 %vm406_vm1, %v375_v45 }
  0xd5   :  { %v376_v48 = vmax.f32 %v233_v47, 0.0 }
  0xd6   :  { %v918_v50 = vpop.f32.mrf.mxu0 }
  0xd7   :  { %965 = vmatprep.mubr.msk.f32.mxu1 %vm406_vm1, %v376_v48  ;;  %v379_v53 = vmax.f32 %v918_v50, 0.0 }
  0xd8   :  { %v243_v51 = vpop.f32.mrf.mxu0  ;;  %966 = vmatmul.mubr.msk.f32.gmra.mxu1 %vm406_vm1, %v377_v49 }
  0xd9   :  { %v378_v52 = vmax.f32 %v243_v51, 0.0 }
  0xda   :  { %v921_v54 = vpop.f32.mrf.mxu0 }
  0xdb   :  { %968 = vmatprep.mubr.msk.f32.mxu1 %vm406_vm1, %v378_v52  ;;  %v381_v57 = vmax.f32 %v921_v54, 0.0 }
  0xdc   :  { %v253_v55 = vpop.f32.mrf.mxu0  ;;  %969 = vmatmul.mubr.msk.f32.gmra.mxu1 %vm406_vm1, %v379_v53 }
  0xdd   :  { %v380_v56 = vmax.f32 %v253_v55, 0.0 }
  0xde   :  { %v924_v58 = vpop.f32.mrf.mxu0 }
  0xdf   :  { %971 = vmatprep.mubr.msk.f32.mxu1 %vm406_vm1, %v380_v56  ;;  %v383_v61 = vmax.f32 %v924_v58, 0.0 }
  0xe0   :  { %v263_v59 = vpop.f32.mrf.mxu0  ;;  %972 = vmatmul.mubr.msk.f32.gmra.mxu1 %vm406_vm1, %v381_v57 }
  0xe1   :  { %v382_v60 = vmax.f32 %v263_v59, 0.0 }
  0xe2   :  { %v927_v62 = vpop.f32.mrf.mxu0 }
  0xe3   :  { %974 = vmatprep.mubr.msk.f32.mxu1 %vm406_vm1, %v382_v60  ;;  %v385_v1 = vmax.f32 %v927_v62, 0.0 }
  0xe4   :  { %v273_v63 = vpop.f32.mrf.mxu0  ;;  %975 = vmatmul.mubr.msk.f32.gmra.mxu1 %vm406_vm1, %v383_v61 }
  0xe5   :  { %v384_v0 = vmax.f32 %v273_v63, 0.0 }
  0xe6   :  { %v930_v2 = vpop.f32.mrf.mxu0 }
  0xe7   :  { %977 = vmatprep.mubr.msk.f32.mxu1 %vm406_vm1, %v384_v0  ;;  %v387_v5 = vmax.f32 %v930_v2, 0.0 }
  0xe8   :  { %v283_v3 = vpop.f32.mrf.mxu0  ;;  %978 = vmatmul.mubr.msk.f32.gmra.mxu1 %vm406_vm1, %v385_v1 }
  0xe9   :  { %v386_v4 = vmax.f32 %v283_v3, 0.0 }
  0xea   :  { %v933_v6 = vpop.f32.mrf.mxu0 }
  0xeb   :  { %980 = vmatprep.mubr.msk.f32.mxu1 %vm406_vm1, %v386_v4  ;;  %v389_v9 = vmax.f32 %v933_v6, 0.0 }
  0xec   :  { %v293_v7 = vpop.f32.mrf.mxu0  ;;  %981 = vmatmul.mubr.msk.f32.gmra.mxu1 %vm406_vm1, %v387_v5 }
  0xed   :  { %v388_v8 = vmax.f32 %v293_v7, 0.0 }
  0xee   :  { %v936_v10 = vpop.f32.mrf.mxu0 }
  0xef   :  { %983 = vmatprep.mubr.msk.f32.mxu1 %vm406_vm1, %v388_v8  ;;  %v391_v13 = vmax.f32 %v936_v10, 0.0 }
  0xf0   :  { %v303_v11 = vpop.f32.mrf.mxu0  ;;  %984 = vmatmul.mubr.msk.f32.gmra.mxu1 %vm406_vm1, %v389_v9 }
  0xf1   :  { %v390_v12 = vmax.f32 %v303_v11, 0.0 }
  0xf2   :  { %v939_v14 = vpop.f32.mrf.mxu0 }
  0xf3   :  { %986 = vmatprep.mubr.msk.f32.mxu1 %vm406_vm1, %v390_v12  ;;  %v393_v17 = vmax.f32 %v939_v14, 0.0 }
  0xf4   :  { %v313_v15 = vpop.f32.mrf.mxu0  ;;  %987 = vmatmul.mubr.msk.f32.gmra.mxu1 %vm406_vm1, %v391_v13 }
  0xf5   :  { %v392_v16 = vmax.f32 %v313_v15, 0.0 }
  0xf6   :  { %v942_v18 = vpop.f32.mrf.mxu0 }
  0xf7   :  { %989 = vmatprep.mubr.msk.f32.mxu1 %vm406_vm1, %v392_v16  ;;  %v395_v21 = vmax.f32 %v942_v18, 0.0 }
  0xf8   :  { %v323_v19 = vpop.f32.mrf.mxu0  ;;  %990 = vmatmul.mubr.msk.f32.gmra.mxu1 %vm406_vm1, %v393_v17 }
  0xf9   :  { %v394_v20 = vmax.f32 %v323_v19, 0.0 }
  0xfa   :  { %v945_v22 = vpop.f32.mrf.mxu0 }
  0xfb   :  { %992 = vmatprep.mubr.msk.f32.mxu1 %vm406_vm1, %v394_v20  ;;  %v397_v25 = vmax.f32 %v945_v22, 0.0 }
  0xfc   :  { %v333_v23 = vpop.f32.mrf.mxu0  ;;  %993 = vmatmul.mubr.msk.f32.gmra.mxu1 %vm406_vm1, %v395_v21 }
  0xfd   :  { %v396_v24 = vmax.f32 %v333_v23, 0.0 }
  0xfe   :  { %v948_v26 = vpop.f32.mrf.mxu0 }
  0xff   :  { %995 = vmatprep.mubr.msk.f32.mxu1 %vm406_vm1, %v396_v24  ;;  %v399_v29 = vmax.f32 %v948_v26, 0.0 }
 0x100   :  { %v343_v27 = vpop.f32.mrf.mxu0  ;;  %996 = vmatmul.mubr.msk.f32.gmra.mxu1 %vm406_vm1, %v397_v25 }
 0x101   :  { %v398_v28 = vmax.f32 %v343_v27, 0.0 }
 0x102   :  { %v951_v30 = vpop.f32.mrf.mxu0 }
 0x103   :  { %998 = vmatprep.mubr.msk.f32.mxu1 %vm406_vm1, %v398_v28  ;;  %v401_v33 = vmax.f32 %v951_v30, 0.0 }
 0x104   :  { %v353_v31 = vpop.f32.mrf.mxu0  ;;  %999 = vmatmul.mubr.msk.f32.gmra.mxu1 %vm406_vm1, %v399_v29 }
 0x105   :  { %v400_v32 = vmax.f32 %v353_v31, 0.0 }
 0x106   :  { %v954_v34 = vpop.f32.mrf.mxu0 }
 0x107   :  { %1001 = vmatprep.mubr.msk.f32.mxu1 %vm406_vm1, %v400_v32  ;;  %v403_v37 = vmax.f32 %v954_v34, 0.0 }
 0x108   :  { %v363_v35 = vpop.f32.mrf.mxu0  ;;  %1002 = vmatmul.mubr.msk.f32.gmra.mxu1 %vm406_vm1, %v401_v33 }
 0x109   :  { %v402_v36 = vmax.f32 %v363_v35, 0.0 }
 0x10b   :  { %1004 = vmatprep.mubr.msk.f32.mxu1 %vm406_vm1, %v402_v36 }
 0x10c   :  { %1005 = vmatmul.mubr.msk.f32.gmra.mxu1 %vm406_vm1, %v403_v37 }
 0x190   :  { %v961_v38 = vpop.f32.mrf.mxu1 }
 0x191   :  { %730 = vst.msk [vmem:[%s1336_s3 + $0x8] sm:$0xff] %vm728_vm2, %v961_v38 }
 0x192   :  { %v569_v39 = vpop.f32.mrf.mxu1 }
 0x193   :  { %729 = vst.msk [vmem:[%s1336_s3] sm:$0xff] %vm728_vm2, %v569_v39 }
 0x194   :  { %v964_v40 = vpop.f32.mrf.mxu1 }
 0x195   :  { %732 = vst.msk [vmem:[%s1336_s3 + $0x18] sm:$0xff] %vm728_vm2, %v964_v40 }
 0x196   :  { %v579_v41 = vpop.f32.mrf.mxu1 }
 0x197   :  { %731 = vst.msk [vmem:[%s1336_s3 + $0x10] sm:$0xff] %vm728_vm2, %v579_v41 }
 0x198   :  { %v967_v42 = vpop.f32.mrf.mxu1 }
 0x199   :  { %734 = vst.msk [vmem:[%s1336_s3 + $0x28] sm:$0xff] %vm728_vm2, %v967_v42 }
 0x19a   :  { %v589_v43 = vpop.f32.mrf.mxu1 }
 0x19b   :  { %733 = vst.msk [vmem:[%s1336_s3 + $0x20] sm:$0xff] %vm728_vm2, %v589_v43 }
 0x19c   :  { %v970_v44 = vpop.f32.mrf.mxu1 }
 0x19d   :  { %736 = vst.msk [vmem:[%s1336_s3 + $0x38] sm:$0xff] %vm728_vm2, %v970_v44 }
 0x19e   :  { %v599_v45 = vpop.f32.mrf.mxu1 }
 0x19f   :  { %735 = vst.msk [vmem:[%s1336_s3 + $0x30] sm:$0xff] %vm728_vm2, %v599_v45 }
 0x1a0   :  { %v973_v46 = vpop.f32.mrf.mxu1 }
 0x1a1   :  { %738 = vst.msk [vmem:[%s1336_s3 + $0x48] sm:$0xff] %vm728_vm2, %v973_v46 }
 0x1a2   :  { %v609_v47 = vpop.f32.mrf.mxu1 }
 0x1a3   :  { %737 = vst.msk [vmem:[%s1336_s3 + $0x40] sm:$0xff] %vm728_vm2, %v609_v47 }
 0x1a4   :  { %v976_v48 = vpop.f32.mrf.mxu1 }
 0x1a5   :  { %740 = vst.msk [vmem:[%s1336_s3 + $0x58] sm:$0xff] %vm728_vm2, %v976_v48 }
 0x1a6   :  { %v619_v49 = vpop.f32.mrf.mxu1 }
 0x1a7   :  { %739 = vst.msk [vmem:[%s1336_s3 + $0x50] sm:$0xff] %vm728_vm2, %v619_v49 }
 0x1a8   :  { %v979_v50 = vpop.f32.mrf.mxu1 }
 0x1a9   :  { %742 = vst.msk [vmem:[%s1336_s3 + $0x68] sm:$0xff] %vm728_vm2, %v979_v50 }
 0x1aa   :  { %v629_v51 = vpop.f32.mrf.mxu1 }
 0x1ab   :  { %741 = vst.msk [vmem:[%s1336_s3 + $0x60] sm:$0xff] %vm728_vm2, %v629_v51 }
 0x1ac   :  { %v982_v52 = vpop.f32.mrf.mxu1 }
 0x1ad   :  { %744 = vst.msk [vmem:[%s1336_s3 + $0x78] sm:$0xff] %vm728_vm2, %v982_v52 }
 0x1ae   :  { %v639_v53 = vpop.f32.mrf.mxu1 }
 0x1af   :  { %743 = vst.msk [vmem:[%s1336_s3 + $0x70] sm:$0xff] %vm728_vm2, %v639_v53 }
 0x1b0   :  { %v985_v54 = vpop.f32.mrf.mxu1 }
 0x1b1   :  { %746 = vst.msk [vmem:[%s1336_s3 + $0x88] sm:$0xff] %vm728_vm2, %v985_v54 }
 0x1b2   :  { %v649_v55 = vpop.f32.mrf.mxu1 }
 0x1b3   :  { %745 = vst.msk [vmem:[%s1336_s3 + $0x80] sm:$0xff] %vm728_vm2, %v649_v55 }
 0x1b4   :  { %v988_v56 = vpop.f32.mrf.mxu1 }
 0x1b5   :  { %748 = vst.msk [vmem:[%s1336_s3 + $0x98] sm:$0xff] %vm728_vm2, %v988_v56 }
 0x1b6   :  { %v659_v57 = vpop.f32.mrf.mxu1 }
 0x1b7   :  { %747 = vst.msk [vmem:[%s1336_s3 + $0x90] sm:$0xff] %vm728_vm2, %v659_v57 }
 0x1b8   :  { %v991_v58 = vpop.f32.mrf.mxu1 }
 0x1b9   :  { %750 = vst.msk [vmem:[%s1336_s3 + $0xa8] sm:$0xff] %vm728_vm2, %v991_v58 }
 0x1ba   :  { %v669_v59 = vpop.f32.mrf.mxu1 }
 0x1bb   :  { %749 = vst.msk [vmem:[%s1336_s3 + $0xa0] sm:$0xff] %vm728_vm2, %v669_v59 }
 0x1bc   :  { %v994_v60 = vpop.f32.mrf.mxu1 }
 0x1bd   :  { %752 = vst.msk [vmem:[%s1336_s3 + $0xb8] sm:$0xff] %vm728_vm2, %v994_v60 }
 0x1be   :  { %v679_v61 = vpop.f32.mrf.mxu1 }
 0x1bf   :  { %751 = vst.msk [vmem:[%s1336_s3 + $0xb0] sm:$0xff] %vm728_vm2, %v679_v61 }
 0x1c0   :  { %v997_v62 = vpop.f32.mrf.mxu1 }
 0x1c1   :  { %754 = vst.msk [vmem:[%s1336_s3 + $0xc8] sm:$0xff] %vm728_vm2, %v997_v62 }
 0x1c2   :  { %v689_v63 = vpop.f32.mrf.mxu1 }
 0x1c3   :  { %753 = vst.msk [vmem:[%s1336_s3 + $0xc0] sm:$0xff] %vm728_vm2, %v689_v63 }
 0x1c4   :  { %v1000_v0 = vpop.f32.mrf.mxu1 }
 0x1c5   :  { %756 = vst.msk [vmem:[%s1336_s3 + $0xd8] sm:$0xff] %vm728_vm2, %v1000_v0 }
 0x1c6   :  { %v699_v1 = vpop.f32.mrf.mxu1 }
 0x1c7   :  { %755 = vst.msk [vmem:[%s1336_s3 + $0xd0] sm:$0xff] %vm728_vm2, %v699_v1 }
 0x1c8   :  { %v1003_v2 = vpop.f32.mrf.mxu1 }
 0x1c9   :  { %758 = vst.msk [vmem:[%s1336_s3 + $0xe8] sm:$0xff] %vm728_vm2, %v1003_v2 }
 0x1ca   :  { %v709_v3 = vpop.f32.mrf.mxu1 }
 0x1cb   :  { %757 = vst.msk [vmem:[%s1336_s3 + $0xe0] sm:$0xff] %vm728_vm2, %v709_v3 }
 0x1cc   :  { %v1006_v4 = vpop.f32.mrf.mxu1 }
 0x1cd   :  { %760 = vst.msk [vmem:[%s1336_s3 + $0xf8] sm:$0xff] %vm728_vm2, %v1006_v4 }
 0x1ce   :  { %v719_v5 = vpop.f32.mrf.mxu1 }
 0x1cf   :  { %759 = vst.msk [vmem:[%s1336_s3 + $0xf0] sm:$0xff] %vm728_vm2, %v719_v5 }

</bundles_post_ra>
